<compile_context>
chip_gen: v6e
topology: v6e:2x2x1
jax: 0.10.0
libtpu: 0.0.40
codegen_flags: <defaults>
</compile_context>

<pallas_src>
from functools import partial

import numpy as np
import jax
import jax.numpy as jnp
from jax import lax
from jax.experimental import pallas as pl
from jax.experimental.pallas import tpu as pltpu


# ----------------------------------------------------------------------------
# Kernel
# ----------------------------------------------------------------------------
def _dwt_kernel(x_ref, m_ref, o_ref):
    # x_ref: (TB, TH, 2*W) VMEM   -- row i of a plane = [even input row | odd input row]
    # m_ref: (2*Wc, 2*Wc)  VMEM   -- constant column pairwise sum/diff (*0.5) matrix
    # o_ref: (TB, 4, TH, Wh) VMEM -- subbands LL, LH, HL, HH
    tb, th, w2 = x_ref.shape
    w = w2 // 2
    wc2 = m_ref.shape[0]        # 2*Wc (column block width on the input side)
    wc = wc2 // 2               # Wc   (column block width on the output side)
    n_cb = w // wc2             # number of column blocks (static)

    m = m_ref[...]              # constant across the whole grid (DMA'd once)
    mxu_dtype = m.dtype         # bf16 for bf16 inputs, f32 otherwise

    # Flatten all batched planes/rows into one tall matmul M dimension.
    xx = x_ref[...].reshape(tb * th, w2).astype(jnp.float32)
    top = xx[:, :w]             # even input rows
    bot = xx[:, w:]             # odd input rows
    rs = (top + bot).astype(mxu_dtype)   # row sums  -> LL / HL
    rd = (top - bot).astype(mxu_dtype)   # row diffs -> LH / HH

    # Column combine per 2*Wc-wide block:
    #   result[:, :Wc] = 0.5*(v[:, 2j] + v[:, 2j+1]);  result[:, Wc:] = 0.5*(v[:, 2j] - v[:, 2j+1])
    for c in range(n_cb):       # static unroll; n_cb = W / 2Wc is small
        i0 = c * wc2
        o0 = c * wc
        ll_hl = jnp.dot(rs[:, i0:i0 + wc2], m, preferred_element_type=jnp.float32)
        lh_hh = jnp.dot(rd[:, i0:i0 + wc2], m, preferred_element_type=jnp.float32)
        o_ref[:, 0, :, o0:o0 + wc] = ll_hl[:, :wc].reshape(tb, th, wc).astype(o_ref.dtype)  # LL
        o_ref[:, 1, :, o0:o0 + wc] = lh_hh[:, :wc].reshape(tb, th, wc).astype(o_ref.dtype)  # LH
        o_ref[:, 2, :, o0:o0 + wc] = ll_hl[:, wc:].reshape(tb, th, wc).astype(o_ref.dtype)  # HL
        o_ref[:, 3, :, o0:o0 + wc] = lh_hh[:, wc:].reshape(tb, th, wc).astype(o_ref.dtype)  # HH


# ----------------------------------------------------------------------------
# Tiling heuristics
# ----------------------------------------------------------------------------
def _choose_col_block(W):
    """Largest supported column-block width (input side) that divides W."""
    for cand in (256, 128):
        if W >= cand and W % cand == 0:
            return cand
    return W  # small / irregular widths: single column block


def _choose_tiles(B, Hh, W, itemsize, target_payload=4 << 20, max_payload=8 << 20):
    """Pick (planes per step TB, Hh-rows per step TH).

    payload per step = input + output bytes = TB*TH * 4*W * itemsize.
    Targets ~4 MiB (cap 8 MiB) so per-step DMA dwarfs the ~0.35us step cost
    while 2x-buffered blocks + f32 temps stay well under 32 MiB of VMEM.
    """
    align = {4: 8, 2: 16, 1: 32}.get(itemsize, 8)   # sublane packing per dtype
    row_bytes = 4 * W * itemsize
    plane_bytes = Hh * row_bytes

    if plane_bytes > max_payload:
        # Wide / tall planes: one plane per step, tile its rows.
        th = max(128, target_payload // row_bytes)          # keep MXU M-dim fed
        th = min(th, max(align, max_payload // row_bytes), Hh)
        th = max(align, (th // align) * align)
        while th > align and Hh % th:
            th -= align
        if Hh % th:
            th = Hh
        return 1, th

    # Small / medium planes: batch whole planes per step.  Keep >= 2 grid
    # steps along the plane axis when possible (v7x megacore sharding).
    tb_cap = max(1, min(B // 2 if B >= 2 else 1,
                        target_payload // max(plane_bytes, 1)))
    tb = 1
    for d in range(tb_cap, 0, -1):
        if B % d == 0:
            tb = d
            break
    th = Hh
    if B // tb < 2:
        # Single step on the plane axis: split rows instead so both cores work.
        half = (Hh // 2 // align) * align
        if half >= align and Hh % half == 0:
            th = half
    return tb, th


# ----------------------------------------------------------------------------
# Public wrapper
# ----------------------------------------------------------------------------
@partial(jax.jit, static_argnames=("channels", "levels"))
def dwt2d_pallas(x, channels, levels=1):
    """x: (N, C, H, W), C == channels. Returns (N, 4*C, H/2, W/2)."""
    N, C, H, W = x.shape
    assert C == channels
    assert H % 2 == 0 and W % 2 == 0, "H and W must be even for the Haar DWT"
    # TODO(synk): levels > 1 recursion in the original module is shape-inconsistent
    # (assigns a (N,4C,H/4,W/4) result into x[:, :1]); only levels=1 is implemented.
    assert levels == 1
    Hh, Wh = H // 2, W // 2
    B = N * C

    # Free (contiguous) reshape: row i of plane (n,c) = [input row 2i | input row 2i+1].
    x2 = x.reshape(B, Hh, 2 * W)

    # Constant block-diagonal column-combine matrix, one (2Wc, 2Wc) block.
    # Coefficient = dec_lo^2 in f32 (~0.5), matching the module's outer-product filters.
    wc2 = _choose_col_block(W)
    wc = wc2 // 2
    s = np.float32(1.0 / np.sqrt(2.0))
    cc = np.float32(s * s)
    m_np = np.zeros((wc2, wc2), np.float32)
    j = np.arange(wc)
    m_np[2 * j, j] = cc
    m_np[2 * j + 1, j] = cc
    m_np[2 * j, wc + j] = cc
    m_np[2 * j + 1, wc + j] = -cc
    mxu_dtype = jnp.bfloat16 if x.dtype == jnp.bfloat16 else jnp.float32
    m = jnp.asarray(m_np, dtype=mxu_dtype)

    TB, TH = _choose_tiles(B, Hh, W, x.dtype.itemsize)
    grid = (B // TB, Hh // TH)

    # TODO(synk): for narrow widths (W < 128) the in-kernel lane slices / stores are
    # not lane-dense; padding W to a multiple of 256 (or packing planes along the lane
    # axis) would help, but typical denoising sizes are already lane-aligned.
    flops = 4 * B * Hh * W * wc2                       # two matmuls, 2 flops/MAC
    bytes_accessed = 4 * B * Hh * W * x.dtype.itemsize + 2 * wc2 * wc2 * m.dtype.itemsize

    out = pl.pallas_call(
        _dwt_kernel,
        out_shape=jax.ShapeDtypeStruct((B, 4, Hh, Wh), x.dtype),
        grid=grid,
        in_specs=[
            pl.BlockSpec((TB, TH, 2 * W), lambda b, h: (b, h, 0)),
            pl.BlockSpec((wc2, wc2), lambda b, h: (0, 0)),   # constant; fetched once
        ],
        out_specs=pl.BlockSpec((TB, 4, TH, Wh), lambda b, h: (b, 0, h, 0)),
        compiler_params=pltpu.CompilerParams(
            dimension_semantics=("parallel", "parallel"),
            vmem_limit_bytes=32 * 1024 * 1024,
        ),
        cost_estimate=pl.CostEstimate(
            flops=int(flops), transcendentals=0, bytes_accessed=int(bytes_accessed)),
    )(x2, m)

    # Free reshape; output channel ordering 4*c + k, exactly like the grouped conv.
    return out.reshape(N, 4 * C, Hh, Wh)


# ----------------------------------------------------------------------------
# Independent reference (grouped stride-2 conv, same as the PyTorch module)
# ----------------------------------------------------------------------------
def _haar_filters():
    s = np.float32(1.0 / np.sqrt(2.0))
    dec_lo = jnp.array([s, s], dtype=jnp.float32)    # dec_lo reversed
    dec_hi = jnp.array([s, -s], dtype=jnp.float32)   # dec_hi reversed
    f_ll = dec_lo[None, :] * dec_lo[:, None]
    f_lh = dec_lo[None, :] * dec_hi[:, None]
    f_hl = dec_hi[None, :] * dec_lo[:, None]
    f_hh = dec_hi[None, :] * dec_hi[:, None]
    return jnp.stack([f_ll, f_lh, f_hl, f_hh], axis=0)   # (4, 2, 2)


def _reference_conv(x, channels):
    filt = _haar_filters()                                   # (4, 2, 2)
    w = jnp.tile(filt, (channels, 1, 1))[:, None, :, :]      # (4*C, 1, 2, 2)
    return lax.conv_general_dilated(
        x, w, window_strides=(2, 2), padding="VALID",
        dimension_numbers=("NCHW", "OIHW", "NCHW"),
        feature_group_count=channels,
    )


if __name__ == "__main__":
    key = jax.random.PRNGKey(0)
    N, C, H, W = 2, 4, 16, 16
    x = jax.random.normal(key, (N, C, H, W), dtype=jnp.float32)

    # f32 path vs grouped-conv reference (tight tolerance).
    y = jax.block_until_ready(dwt2d_pallas(x, channels=C))
    y_ref = jax.block_until_ready(_reference_conv(x, channels=C))
    assert y.shape == (N, 4 * C, H // 2, W // 2)
    assert np.allclose(np.asarray(y), np.asarray(y_ref), atol=1e-5, rtol=1e-5)

    # bf16 path (native MXU operands), loose tolerance vs f32 reference of the bf16 input.
    xb = x.astype(jnp.bfloat16)
    yb = jax.block_until_ready(dwt2d_pallas(xb, channels=C))
    yb_ref = jax.block_until_ready(_reference_conv(xb.astype(jnp.float32), channels=C))
    assert yb.dtype == jnp.bfloat16
    assert np.allclose(np.asarray(yb, dtype=np.float32), np.asarray(yb_ref),
                       atol=5e-2, rtol=5e-2)

    print("KERNEL_OK")
</pallas_src>

<mosaic_0001>
module attributes {stable_mosaic.version = 11 : i64} {
  func.func @_dwt_kernel(%arg0: i32, %arg1: i32, %arg2: memref<4x8x32xf32, #tpu.memory_space<vmem>>, %arg3: memref<16x16xf32, #tpu.memory_space<vmem>>, %arg4: memref<4x4x8x8xf32, #tpu.memory_space<vmem>>) attributes {dimension_semantics = [#tpu.dimension_semantics<parallel>, #tpu.dimension_semantics<parallel>], iteration_bounds = array<i64: 2, 1>, scalar_prefetch = 0 : i64, scratch_operands = 0 : i64, tpu.core_type = #tpu.core_type<tc>, window_params = [{transform_indices = @transform_0, window_bounds = array<i64: 4, 8, 32>}, {pipeline_mode = #tpu.pipeline_mode<synchronous>, transform_indices = @transform_1, window_bounds = array<i64: 16, 16>}, {transform_indices = @transform_2, window_bounds = array<i64: 4, 4, 8, 8>}]} {
    %c0 = arith.constant 0 : index
    %c0_0 = arith.constant 0 : index
    %0 = vector.load %arg3[%c0, %c0_0] : memref<16x16xf32, #tpu.memory_space<vmem>>, vector<16x16xf32>
    %c0_1 = arith.constant 0 : index
    %c0_2 = arith.constant 0 : index
    %c0_3 = arith.constant 0 : index
    %1 = vector.load %arg2[%c0_1, %c0_2, %c0_3] : memref<4x8x32xf32, #tpu.memory_space<vmem>>, vector<4x8x32xf32>
    %2 = vector.shape_cast %1 : vector<4x8x32xf32> to vector<32x32xf32>
    %3 = vector.extract_strided_slice %2 {offsets = [0, 0], sizes = [32, 16], strides = [1, 1]} : vector<32x32xf32> to vector<32x16xf32>
    %4 = vector.extract_strided_slice %2 {offsets = [0, 16], sizes = [32, 16], strides = [1, 1]} : vector<32x32xf32> to vector<32x16xf32>
    %5 = arith.addf %3, %4 : vector<32x16xf32>
    %6 = arith.subf %3, %4 : vector<32x16xf32>
    %cst = arith.constant dense<0.000000e+00> : vector<32x16xf32>
    %7 = tpu.matmul %5, %0, %cst {dimension_numbers = #tpu.dot_dimension_numbers<[1], [0], [0], [1], [0, 0, 1, 1], [], []>} : vector<32x16xf32>, vector<16x16xf32>, vector<32x16xf32> -> vector<32x16xf32>
    %cst_4 = arith.constant dense<0.000000e+00> : vector<32x16xf32>
    %8 = tpu.matmul %6, %0, %cst_4 {dimension_numbers = #tpu.dot_dimension_numbers<[1], [0], [0], [1], [0, 0, 1, 1], [], []>} : vector<32x16xf32>, vector<16x16xf32>, vector<32x16xf32> -> vector<32x16xf32>
    %9 = vector.extract_strided_slice %7 {offsets = [0, 0], sizes = [32, 8], strides = [1, 1]} : vector<32x16xf32> to vector<32x8xf32>
    %10 = vector.shape_cast %9 : vector<32x8xf32> to vector<4x8x8xf32>
    %c0_5 = arith.constant 0 : index
    %c0_6 = arith.constant 0 : index
    %c0_7 = arith.constant 0 : index
    %c0_8 = arith.constant 0 : index
    %11 = vector.load %arg4[%c0_5, %c0_6, %c0_7, %c0_8] : memref<4x4x8x8xf32, #tpu.memory_space<vmem>>, vector<4x1x8x8xf32>
    %12 = vector.shape_cast %11 : vector<4x1x8x8xf32> to vector<4x8x8xf32>
    %13 = vector.shape_cast %10 : vector<4x8x8xf32> to vector<4x1x8x8xf32>
    tpu.vector_store %arg4[%c0_5, %c0_6, %c0_7, %c0_8], %13 {strides = array<i32>} : memref<4x4x8x8xf32, #tpu.memory_space<vmem>>, vector<4x1x8x8xf32>,
    %14 = vector.extract_strided_slice %8 {offsets = [0, 0], sizes = [32, 8], strides = [1, 1]} : vector<32x16xf32> to vector<32x8xf32>
    %15 = vector.shape_cast %14 : vector<32x8xf32> to vector<4x8x8xf32>
    %c0_9 = arith.constant 0 : index
    %c1 = arith.constant 1 : index
    %c0_10 = arith.constant 0 : index
    %c0_11 = arith.constant 0 : index
    %16 = vector.load %arg4[%c0_9, %c1, %c0_10, %c0_11] : memref<4x4x8x8xf32, #tpu.memory_space<vmem>>, vector<4x1x8x8xf32>
    %17 = vector.shape_cast %16 : vector<4x1x8x8xf32> to vector<4x8x8xf32>
    %18 = vector.shape_cast %15 : vector<4x8x8xf32> to vector<4x1x8x8xf32>
    tpu.vector_store %arg4[%c0_9, %c1, %c0_10, %c0_11], %18 {strides = array<i32>} : memref<4x4x8x8xf32, #tpu.memory_space<vmem>>, vector<4x1x8x8xf32>,
    %19 = vector.extract_strided_slice %7 {offsets = [0, 8], sizes = [32, 8], strides = [1, 1]} : vector<32x16xf32> to vector<32x8xf32>
    %20 = vector.shape_cast %19 : vector<32x8xf32> to vector<4x8x8xf32>
    %c0_12 = arith.constant 0 : index
    %c2 = arith.constant 2 : index
    %c0_13 = arith.constant 0 : index
    %c0_14 = arith.constant 0 : index
    %21 = vector.load %arg4[%c0_12, %c2, %c0_13, %c0_14] : memref<4x4x8x8xf32, #tpu.memory_space<vmem>>, vector<4x1x8x8xf32>
    %22 = vector.shape_cast %21 : vector<4x1x8x8xf32> to vector<4x8x8xf32>
    %23 = vector.shape_cast %20 : vector<4x8x8xf32> to vector<4x1x8x8xf32>
    tpu.vector_store %arg4[%c0_12, %c2, %c0_13, %c0_14], %23 {strides = array<i32>} : memref<4x4x8x8xf32, #tpu.memory_space<vmem>>, vector<4x1x8x8xf32>,
    %24 = vector.extract_strided_slice %8 {offsets = [0, 8], sizes = [32, 8], strides = [1, 1]} : vector<32x16xf32> to vector<32x8xf32>
    %25 = vector.shape_cast %24 : vector<32x8xf32> to vector<4x8x8xf32>
    %c0_15 = arith.constant 0 : index
    %c3 = arith.constant 3 : index
    %c0_16 = arith.constant 0 : index
    %c0_17 = arith.constant 0 : index
    %26 = vector.load %arg4[%c0_15, %c3, %c0_16, %c0_17] : memref<4x4x8x8xf32, #tpu.memory_space<vmem>>, vector<4x1x8x8xf32>
    %27 = vector.shape_cast %26 : vector<4x1x8x8xf32> to vector<4x8x8xf32>
    %28 = vector.shape_cast %25 : vector<4x8x8xf32> to vector<4x1x8x8xf32>
    tpu.vector_store %arg4[%c0_15, %c3, %c0_16, %c0_17], %28 {strides = array<i32>} : memref<4x4x8x8xf32, #tpu.memory_space<vmem>>, vector<4x1x8x8xf32>,
    return
  }
  func.func @transform_0(%arg0: i32, %arg1: i32) -> (i32, i32, i32) {
    %c0_i32 = arith.constant 0 : i32
    %c0_i32_0 = arith.constant 0 : i32
    return %arg0, %arg1, %c0_i32 : i32, i32, i32
  }
  func.func @transform_1(%arg0: i32, %arg1: i32) -> (i32, i32) {
    %c0_i32 = arith.constant 0 : i32
    %c0_i32_0 = arith.constant 0 : i32
    %c0_i32_1 = arith.constant 0 : i32
    return %c0_i32, %c0_i32_0 : i32, i32
  }
  func.func @transform_2(%arg0: i32, %arg1: i32) -> (i32, i32, i32, i32) {
    %c0_i32 = arith.constant 0 : i32
    %c0_i32_0 = arith.constant 0 : i32
    %c0_i32_1 = arith.constant 0 : i32
    return %arg0, %c0_i32, %arg1, %c0_i32_0 : i32, i32, i32, i32
  }
}

</mosaic_0001>

<bundles_post_ra>
// kernel: dwt2d_pallas.1
= control target key start
LH: loop header
LB: loop body
LE: loop exit
PB: predicated region body
PF: predicated region fallthrough
CT: control target
= control target key end

     0   :  { %s673_s9 = smov 0   ;;  %s675_s10 = smov 0   ;;  %s758_s0 = inlined_call_operand.vmem [shape: f32[8,8,32], index: 0, kind: input, shape index: {}]   ;;  %s759_s1 = inlined_call_operand.vmem [shape: f32[16,16], index: 1, kind: input, shape index: {}]   ;;  %s760_s2 = inlined_call_operand.vmem [shape: f32[8,4,8,8], index: 2, kind: output, shape index: {}]  }
   0x1   :  { %s677_s11 = smov 0  }
   0x2 LB: > { %s24_s12 = sadd.s32 1, %s650_s10  ;;  %p545_p0 = scmp.ge.s32.totalorder %s654_s11, 1  ;;  %s654_s11 = sphi %s677_s11, %s12_s11   ;;  %s650_s10 = sphi %s675_s10, %s762_s10   ;;  %s646_s9 = sphi %s673_s9, %s761_s9  }
   0x3   : > { %p26_p1 = scmp.ge.s32.totalorder %s24_s12, 2  ;;  %p132_p2 = scmp.lt.s32.totalorder %s654_s11, 3 }
   0x5   : > { %s764_s12 = smov (%p26_p1, %s24_s12), 0  ;;  %p133_p3 = pnand %p545_p0, %p132_p2 }
   0x6   : > { %s546_s13 = sshll.u32 (!%p133_p3), %s646_s9, 2  ;;  %s656_s22 = smov (!%p133_p3), 112  }
   0x7   : > { %136 = sbr.rel (%p133_p3) target bundleno = 459 (0x1cb), region = 28  ;;  %p162_p4 = scmp.lt.s32.totalorder (!%p133_p3), %s546_s13, 7 }
   0x8   : > { %s657_s27 = smov (!%p133_p3), 120  }
   0xc   : > { %v181_v0 = vld [vmem:[%s759_s1 + $0x8] sm:$0xff]  ;;  %v180_v1 = vld [vmem:[%s759_s1] sm:$0xff]  ;;  %s766_s13 = smov (!%p162_p4, %s546_s13), 7  ;;  %vm210_vm0 = vcmask 130048   ;;  %vm405_vm1 = vcmask 64512  }
   0xd   : > { %586 = vmatprep.subr.mxu0 %v181_v0  ;;  %596 = vmatprep.subr.mxu1 %v181_v0  ;;  %s547_s18 = sshll.u32 %s766_s13, 3  ;;  %s573_s23 = sshll.u32 %s766_s13, 5 }
   0xe   : > { %587 = vmatpush3.msra.mxu0 %v181_v0  ;;  %597 = vmatpush3.msra.mxu1 %v181_v0  ;;  %s168_s21 = scalar_lea.vmem %s758_s0, %s547_s18  ;;  %s715_s26 = scalar_lea.vmem %s760_s2, %s573_s23 }
   0xf   : > { %588 = vmatprep.subr.mxu0 %v180_v1  ;;  %598 = vmatprep.subr.mxu1 %v180_v1  ;;  %v182_v2 = vld [vmem:[%s168_s21] sm:$0xff]  ;;  %v184_v3 = vld [vmem:[%s168_s21 + $0x10] sm:$0xff]  ;;  %v183_v4 = vld [vmem:[%s168_s21 + $0x8] sm:$0xff] }
  0x10   : > { %589 = vmatpush3.msra.mxu0 %v180_v1  ;;  %599 = vmatpush3.msra.mxu1 %v180_v1  ;;  %v185_v5 = vld [vmem:[%s168_s21 + $0x18] sm:$0xff] }
  0x11   : > { %190 = vrot.lane.b32.xlu0 %v182_v2, %s656_s22  ;;  %194 = vrot.lane.b32.xlu1 %v184_v3, %s656_s22 }
  0x15   : > { %192 = vrot.lane.b32.xlu0 %v183_v4, %s656_s22  ;;  %196 = vrot.lane.b32.xlu1 %v185_v5, %s656_s22 }
  0x83   : > { %v191_v6 = vpop.permute.xlu0 %190  ;;  %v195_v7 = vpop.permute.xlu1 %194 }
  0x84   : > { %v202_v8 = vadd.f32 %v191_v6, %v182_v2  ;;  %v206_v9 = vsub.f32 %v182_v2, %v191_v6  ;;  %v204_v10 = vadd.f32 %v195_v7, %v184_v3  ;;  %v208_v11 = vsub.f32 %v184_v3, %v195_v7 }
  0x86   : > { %590 = vmatprep.mubr.msk.f32.mxu0 %vm210_vm0, %v202_v8  ;;  %600 = vmatprep.mubr.msk.f32.mxu1 %vm210_vm0, %v206_v9 }
  0x87   : > { %v193_v12 = vpop.permute.xlu0 %192  ;;  %v197_v13 = vpop.permute.xlu1 %196 }
  0x88   : > { %v203_v14 = vadd.f32 %v193_v12, %v183_v4  ;;  %v207_v15 = vsub.f32 %v183_v4, %v193_v12  ;;  %v205_v16 = vadd.f32 %v197_v13, %v185_v5  ;;  %v209_v17 = vsub.f32 %v185_v5, %v197_v13 }
  0x8a   : > { %591 = vmatmul.mubr.msk.f32.vlgmr.msra.gmra.mxu0 %vm210_vm0, %v203_v14  ;;  %601 = vmatmul.mubr.msk.f32.vlgmr.msra.gmra.mxu1 %vm210_vm0, %v207_v15 }
  0x8b   : > { %593 = vmatprep.mubr.msk.f32.mxu0 %vm210_vm0, %v204_v10  ;;  %603 = vmatprep.mubr.msk.f32.mxu1 %vm210_vm0, %v208_v11 }
  0x8e   : > { %594 = vmatmul.mubr.msk.f32.gmra.mxu0 %vm210_vm0, %v205_v16  ;;  %604 = vmatmul.mubr.msk.f32.gmra.mxu1 %vm210_vm0, %v209_v17 }
 0x14a   : > { %v592_v18 = vpop.f32.mrf.mxu0  ;;  %v602_v19 = vpop.f32.mrf.mxu1 }
 0x14b   : > { %421 = vrot.lane.b32.xlu0 %v592_v18, %s657_s27  ;;  %442 = vrot.lane.b32.xlu1 %v602_v19, %s657_s27  ;;  %407 = vst.msk [vmem:[%s715_s26 + $0x20] sm:$0xff] %vm405_vm1, %v592_v18  ;;  %560 = vst.msk [vmem:[%s715_s26 + $0x28] sm:$0xff] %vm405_vm1, %v602_v19 }
 0x14c   : > { %v289_v20 = vpop.f32.mrf.mxu0  ;;  %v386_v21 = vpop.f32.mrf.mxu1 }
 0x14d   : > { %406 = vst.msk [vmem:[%s715_s26] sm:$0xff] %vm405_vm1, %v289_v20  ;;  %559 = vst.msk [vmem:[%s715_s26 + $0x8] sm:$0xff] %vm405_vm1, %v386_v21 }
 0x14e   : > { %v595_v22 = vpop.f32.mrf.mxu0  ;;  %v605_v23 = vpop.f32.mrf.mxu1 }
 0x14f   : > { %419 = vrot.lane.b32.xlu0 %v289_v20, %s657_s27  ;;  %440 = vrot.lane.b32.xlu1 %v386_v21, %s657_s27  ;;  %409 = vst.msk [vmem:[%s715_s26 + $0x60] sm:$0xff] %vm405_vm1, %v595_v22  ;;  %562 = vst.msk [vmem:[%s715_s26 + $0x68] sm:$0xff] %vm405_vm1, %v605_v23 }
 0x150   : > { %v299_v24 = vpop.f32.mrf.mxu0  ;;  %v396_v25 = vpop.f32.mrf.mxu1 }
 0x151   : > { %408 = vst.msk [vmem:[%s715_s26 + $0x40] sm:$0xff] %vm405_vm1, %v299_v24  ;;  %561 = vst.msk [vmem:[%s715_s26 + $0x48] sm:$0xff] %vm405_vm1, %v396_v25 }
 0x153   : > { %423 = vrot.lane.b32.xlu0 %v299_v24, %s657_s27  ;;  %444 = vrot.lane.b32.xlu1 %v396_v25, %s657_s27 }
 0x157   : > { %425 = vrot.lane.b32.xlu0 %v595_v22, %s657_s27  ;;  %446 = vrot.lane.b32.xlu1 %v605_v23, %s657_s27 }
 0x1bd   : > { %v422_v26 = vpop.permute.xlu0 %421  ;;  %v443_v27 = vpop.permute.xlu1 %442 }
 0x1be   : > { %564 = vst.msk [vmem:[%s715_s26 + $0x30] sm:$0xff] %vm405_vm1, %v422_v26  ;;  %568 = vst.msk [vmem:[%s715_s26 + $0x38] sm:$0xff] %vm405_vm1, %v443_v27 }
 0x1c1   : > { %v420_v28 = vpop.permute.xlu0 %419  ;;  %v441_v29 = vpop.permute.xlu1 %440 }
 0x1c2   : > { %563 = vst.msk [vmem:[%s715_s26 + $0x10] sm:$0xff] %vm405_vm1, %v420_v28  ;;  %567 = vst.msk [vmem:[%s715_s26 + $0x18] sm:$0xff] %vm405_vm1, %v441_v29 }
 0x1c5   : > { %v424_v30 = vpop.permute.xlu0 %423  ;;  %v445_v31 = vpop.permute.xlu1 %444 }
 0x1c6   : > { %565 = vst.msk [vmem:[%s715_s26 + $0x50] sm:$0xff] %vm405_vm1, %v424_v30  ;;  %569 = vst.msk [vmem:[%s715_s26 + $0x58] sm:$0xff] %vm405_vm1, %v445_v31 }
 0x1c9   : > { %v426_v32 = vpop.permute.xlu0 %425  ;;  %v447_v33 = vpop.permute.xlu1 %446 }
 0x1ca   : > { %566 = vst.msk [vmem:[%s715_s26 + $0x70] sm:$0xff] %vm405_vm1, %v426_v32  ;;  %570 = vst.msk [vmem:[%s715_s26 + $0x78] sm:$0xff] %vm405_vm1, %v447_v33 }
 0x1cb PF: > { %s12_s11 = sadd.s32 1, %s654_s11   ;;  %s761_s9 = smov %s650_s10 }
 0x1cc   : > { %p9_p5 = scmp.ge.s32.totalorder %s12_s11, 4   ;;  %s762_s10 = smov %s764_s12 }
 0x1ce   :  { %11 = sbr.rel (!%p9_p5) target bundleno = 2 (0x2), region = 61 }

</bundles_post_ra>
